<compile_context>
chip_gen: v7x
topology: tpu7x:2x2x1
jax: 0.10.0
libtpu: 0.0.40
codegen_flags: <defaults>
</compile_context>

<pallas_src>
import jax
import jax.numpy as jnp
from jax.experimental import pallas as pl
from jax.experimental.pallas import tpu as pltpu

_DEFAULT_TILE = 512


def _round_up(x: int, m: int) -> int:
    return ((x + m - 1) // m) * m


def _derive_vmem_limit(tm: int, tk: int, k_pad: int, d_pad: int) -> int:
    """VMEM budget from the actual buffer sum (not a fixed number sized for 128 MiB parts)."""
    g_bytes = 2 * (tm * tk * 2)          # bf16 G tile, double-buffered
    e_bytes = 2 * (k_pad * d_pad * 4)    # resident f32 E (conservatively counted x2)
    o_bytes = 2 * (tm * d_pad * 4)       # f32 output tile
    need = int((g_bytes + e_bytes + o_bytes) * 1.5) + (4 << 20)   # pipeline / scratch margin
    return max(16 << 20, min(need, 64 << 20))                      # cap at v7x physical VMEM


# ----------------------------- Pallas kernels -----------------------------

def _bipartite_layer_kernel(g_ref, e_ref, out_ref):
    """out[i_tile, :] += G[i_tile, k_tile] @ E[k_tile, :] over the (arbitrary) K axis.

    g_ref:   (TM, TK)      bf16 tile of one off-diagonal adjacency block (streamed)
    e_ref:   (K_pad, Dp)   f32 current-layer embeddings (VMEM-resident, DMA'd once)
    out_ref: (TM, Dp)      f32 output tile; block index constant across K -> accumulator
    """
    k = pl.program_id(1)
    tk = g_ref.shape[1]

    @pl.when(k == 0)
    def _():
        out_ref[...] = jnp.zeros_like(out_ref)

    start = pl.multiple_of(k * tk, tk)
    e_tile = e_ref[pl.ds(start, tk), :].astype(jnp.bfloat16)
    out_ref[...] += jnp.dot(g_ref[...], e_tile,
                            preferred_element_type=jnp.float32)


def _score_kernel(u_ref, i_ref, o_ref):
    """gamma[b] = sum_d u[d, b] * i[d, b].  Batch on lanes -> lane-dense (1, TB) store."""
    prod = u_ref[...] * i_ref[...]                      # (D, TB) f32, VPU
    o_ref[...] = jnp.sum(prod, axis=0, keepdims=True)   # (1, TB), sublane reduce


# ----------------------------- Wrappers -----------------------------------

def _make_rect_matmul(m_pad: int, k_pad: int, d_pad: int, tm: int, tk: int):
    """Tiled (m_pad, k_pad) @ (k_pad, d_pad) -> (m_pad, d_pad) f32, resident RHS."""
    return pl.pallas_call(
        _bipartite_layer_kernel,
        out_shape=jax.ShapeDtypeStruct((m_pad, d_pad), jnp.float32),
        grid_spec=pltpu.PrefetchScalarGridSpec(
            num_scalar_prefetch=0,
            grid=(m_pad // tm, k_pad // tk),
            in_specs=[
                pl.BlockSpec((tm, tk), lambda i, k: (i, k)),        # stream G tiles
                pl.BlockSpec((k_pad, d_pad), lambda i, k: (0, 0)),  # E resident in VMEM
            ],
            out_specs=pl.BlockSpec((tm, d_pad), lambda i, k: (i, 0)),
        ),
        compiler_params=pltpu.CompilerParams(
            dimension_semantics=("parallel", "arbitrary"),
            vmem_limit_bytes=_derive_vmem_limit(tm, tk, k_pad, d_pad),
        ),
    )


def prepare_bipartite_graph(R: jax.Array, *, tile: int = _DEFAULT_TILE):
    """D^{-1/2} A D^{-1/2} for the bipartite graph, as its two nonzero off-diagonal
    blocks, padded + quantized to bf16 ONCE (hoisted out of the per-forward path)."""
    n_users, m_items = R.shape
    deg_u = jnp.sum(R, axis=1)
    deg_i = jnp.sum(R, axis=0)
    du = jnp.where(deg_u > 0, 1.0 / jnp.sqrt(jnp.maximum(deg_u, 1e-12)), 0.0)
    di = jnp.where(deg_i > 0, 1.0 / jnp.sqrt(jnp.maximum(deg_i, 1e-12)), 0.0)
    g_ui = R * du[:, None] * di[None, :]                     # (U, I) f32

    tu = min(tile, _round_up(n_users, 128))
    ti = min(tile, _round_up(m_items, 128))
    u_pad = _round_up(n_users, tu)
    i_pad = _round_up(m_items, ti)

    g_ui_p = jnp.pad(g_ui, ((0, u_pad - n_users), (0, i_pad - m_items))).astype(jnp.bfloat16)
    g_iu_p = jnp.pad(g_ui.T, ((0, i_pad - m_items), (0, u_pad - n_users))).astype(jnp.bfloat16)
    return g_ui_p, g_iu_p


def lightgcn_propagate(g_ui: jax.Array, g_iu: jax.Array,
                       user_emb: jax.Array, item_emb: jax.Array,
                       n_layers: int, *, tile: int = _DEFAULT_TILE):
    """LightGCN 'computer': per-layer E_u' = G_ui @ E_i, E_i' = G_iu @ E_u, then mean."""
    U, D = user_emb.shape
    n_items = item_emb.shape[0]
    u_pad, i_pad = g_ui.shape
    assert g_iu.shape == (i_pad, u_pad)
    d_pad = _round_up(D, 128)

    # Tile sizes: divide the (already padded) dims by construction of prepare_bipartite_graph.
    tu = min(tile, u_pad)
    ti = min(tile, i_pad)
    # Keep >= 2 row tiles when possible so both v7x TensorCores get work on the parallel axis.
    if u_pad // tu == 1 and tu >= 256:
        tu //= 2
    if i_pad // ti == 1 and ti >= 256:
        ti //= 2

    e_u = jnp.pad(user_emb.astype(jnp.float32), ((0, u_pad - U), (0, d_pad - D)))
    e_i = jnp.pad(item_emb.astype(jnp.float32), ((0, i_pad - n_items), (0, d_pad - D)))

    mm_u = _make_rect_matmul(u_pad, i_pad, d_pad, tu, ti)   # G_ui @ E_i
    mm_i = _make_rect_matmul(i_pad, u_pad, d_pad, ti, tu)   # G_iu @ E_u

    # Layer loop: the O(N*D) running sum is negligible next to the O(N^2*D/2) matmuls,
    # so it stays as plain-JAX glue on f32 arrays (no per-layer re-cast pass).
    tot_u, tot_i = e_u, e_i
    cur_u, cur_i = e_u, e_i
    for _ in range(n_layers):
        new_u = mm_u(g_ui, cur_i)
        new_i = mm_i(g_iu, cur_u)
        cur_u, cur_i = new_u, new_i
        tot_u = tot_u + new_u
        tot_i = tot_i + new_i

    scale = 1.0 / float(n_layers + 1)
    return (tot_u * scale)[:U, :D], (tot_i * scale)[:n_items, :D]


def lightgcn_score(users_emb: jax.Array, items_emb: jax.Array,
                   *, tile_b: int = 512) -> jax.Array:
    """gamma = sum(users_emb * items_emb, dim=1) with a lane-dense (1, B_pad) output."""
    B, D = users_emb.shape
    tb = min(tile_b, _round_up(B, 128))
    b_pad = _round_up(B, tb)

    # Batch -> lanes, D -> sublanes so the output store is a full-width vst.
    u_t = jnp.pad(users_emb.astype(jnp.float32), ((0, b_pad - B), (0, 0))).T  # (D, B_pad)
    i_t = jnp.pad(items_emb.astype(jnp.float32), ((0, b_pad - B), (0, 0))).T  # (D, B_pad)

    out = pl.pallas_call(
        _score_kernel,
        out_shape=jax.ShapeDtypeStruct((1, b_pad), jnp.float32),
        grid_spec=pltpu.PrefetchScalarGridSpec(
            num_scalar_prefetch=0,
            grid=(b_pad // tb,),
            in_specs=[
                pl.BlockSpec((D, tb), lambda b: (0, b)),
                pl.BlockSpec((D, tb), lambda b: (0, b)),
            ],
            out_specs=pl.BlockSpec((1, tb), lambda b: (0, b)),
        ),
        compiler_params=pltpu.CompilerParams(
            dimension_semantics=("parallel",),
        ),
    )(u_t, i_t)
    return out[0, :B]


def lightgcn_forward(user_emb, item_emb, g_ui, g_iu, users, items, n_layers):
    """Equivalent of LightGCN.forward(users, items).  g_ui/g_iu come from
    prepare_bipartite_graph (quantize/pad already hoisted out of this path)."""
    light_users, light_items = lightgcn_propagate(g_ui, g_iu, user_emb, item_emb, n_layers)
    users_emb = light_users[users]   # gather: plain-JAX glue
    items_emb = light_items[items]
    return lightgcn_score(users_emb, items_emb)


# ----------------------------- Main ----------------------------------------

if __name__ == "__main__":
    # Small synthetic config (mirrors LightGCN.__init_weight shapes).
    num_users = 48
    num_items = 80
    latent_dim = 64          # config['latent_dim_rec']
    n_layers = 3             # config['lightGCN_n_layers']
    batch = 8

    key = jax.random.PRNGKey(0)
    k_u, k_i, k_r, k_uid, k_iid = jax.random.split(key, 5)

    # nn.init.normal_(std=0.1) embeddings
    user_emb = 0.1 * jax.random.normal(k_u, (num_users, latent_dim), jnp.float32)
    item_emb = 0.1 * jax.random.normal(k_i, (num_items, latent_dim), jnp.float32)

    # Synthetic user-item interaction matrix -> normalized bipartite adjacency blocks
    # (prepared once; not part of the per-forward path).
    R = (jax.random.uniform(k_r, (num_users, num_items)) < 0.1).astype(jnp.float32)
    g_ui, g_iu = prepare_bipartite_graph(R)

    users = jax.random.randint(k_uid, (batch,), 0, num_users, jnp.int32)
    items = jax.random.randint(k_iid, (batch,), 0, num_items, jnp.int32)

    fwd = jax.jit(lightgcn_forward, static_argnums=(6,))
    gamma = fwd(user_emb, item_emb, g_ui, g_iu, users, items, n_layers)
    gamma = jax.block_until_ready(gamma)

    # Pure-JAX reference mirroring the kernel arithmetic (bf16 adjacency blocks and
    # per-layer bf16 E inputs, f32 accumulation) so the assertion checks the kernel.
    deg_u = jnp.sum(R, axis=1)
    deg_i = jnp.sum(R, axis=0)
    du = jnp.where(deg_u > 0, 1.0 / jnp.sqrt(jnp.maximum(deg_u, 1e-12)), 0.0)
    di = jnp.where(deg_i > 0, 1.0 / jnp.sqrt(jnp.maximum(deg_i, 1e-12)), 0.0)
    g_ui_f = R * du[:, None] * di[None, :]
    g_ui_q = g_ui_f.astype(jnp.bfloat16)
    g_iu_q = g_ui_f.T.astype(jnp.bfloat16)

    cur_u, cur_i = user_emb, item_emb
    tot_u, tot_i = user_emb, item_emb
    for _ in range(n_layers):
        nu = jnp.dot(g_ui_q, cur_i.astype(jnp.bfloat16), preferred_element_type=jnp.float32)
        ni = jnp.dot(g_iu_q, cur_u.astype(jnp.bfloat16), preferred_element_type=jnp.float32)
        cur_u, cur_i = nu, ni
        tot_u = tot_u + nu
        tot_i = tot_i + ni
    light_u_ref = tot_u / float(n_layers + 1)
    light_i_ref = tot_i / float(n_layers + 1)
    gamma_ref = jnp.sum(light_u_ref[users] * light_i_ref[items], axis=1)

    assert gamma.shape == (batch,)
    assert jnp.allclose(gamma, gamma_ref, rtol=2e-3, atol=1e-5), (gamma, gamma_ref)
    print("KERNEL_OK")
</pallas_src>

<mosaic_0001>
module attributes {stable_mosaic.version = 11 : i64} {
  func.func @_bipartite_layer_kernel(%arg0: i32, %arg1: i32, %arg2: memref<128x128xbf16, #tpu.memory_space<vmem>>, %arg3: memref<128x128xf32, #tpu.memory_space<vmem>>, %arg4: memref<128x128xf32, #tpu.memory_space<vmem>>) attributes {dimension_semantics = [#tpu.dimension_semantics<parallel>, #tpu.dimension_semantics<arbitrary>], iteration_bounds = array<i64: 1, 1>, scalar_prefetch = 0 : i64, scratch_operands = 0 : i64, tpu.core_type = #tpu.core_type<tc>, window_params = [{transform_indices = @transform_0, window_bounds = array<i64: 128, 128>}, {pipeline_mode = #tpu.pipeline_mode<synchronous>, transform_indices = @transform_1, window_bounds = array<i64: 128, 128>}, {transform_indices = @transform_2, window_bounds = array<i64: 128, 128>}]} {
    %c0_i32 = arith.constant 0 : i32
    %0 = arith.cmpi eq, %arg1, %c0_i32 : i32
    %1 = arith.extui %0 : i1 to i32
    %c0_i32_0 = arith.constant 0 : i32
    %2 = arith.cmpi ne, %1, %c0_i32_0 : i32
    scf.if %2 {
      %cst_7 = arith.constant 0.000000e+00 : f32
      %13 = vector.broadcast %cst_7 : f32 to vector<128x128xf32>
      %c0_8 = arith.constant 0 : index
      %c0_9 = arith.constant 0 : index
      %14 = vector.load %arg4[%c0_8, %c0_9] : memref<128x128xf32, #tpu.memory_space<vmem>>, vector<128x128xf32>
      tpu.vector_store %arg4[%c0_8, %c0_9], %13 {strides = array<i32>} : memref<128x128xf32, #tpu.memory_space<vmem>>, vector<128x128xf32>,
    } else {
    }
    %c128_i32 = arith.constant 128 : i32
    %3 = arith.muli %arg1, %c128_i32 : i32
    %4 = tpu.assume_multiple %3, 128 : i32
    %5 = arith.index_cast %4 : i32 to index
    %c0 = arith.constant 0 : index
    %6 = vector.load %arg3[%5, %c0] : memref<128x128xf32, #tpu.memory_space<vmem>>, vector<128x128xf32>
    %7 = arith.truncf %6 : vector<128x128xf32> to vector<128x128xbf16>
    %c0_1 = arith.constant 0 : index
    %c0_2 = arith.constant 0 : index
    %8 = vector.load %arg4[%c0_1, %c0_2] : memref<128x128xf32, #tpu.memory_space<vmem>>, vector<128x128xf32>
    %c0_3 = arith.constant 0 : index
    %c0_4 = arith.constant 0 : index
    %9 = vector.load %arg2[%c0_3, %c0_4] : memref<128x128xbf16, #tpu.memory_space<vmem>>, vector<128x128xbf16>
    %cst = arith.constant dense<0.000000e+00> : vector<128x128xf32>
    %10 = tpu.matmul %9, %7, %cst {dimension_numbers = #tpu.dot_dimension_numbers<[1], [0], [0], [1], [0, 0, 1, 1], [], []>} : vector<128x128xbf16>, vector<128x128xbf16>, vector<128x128xf32> -> vector<128x128xf32>
    %11 = arith.addf %8, %10 : vector<128x128xf32>
    %c0_5 = arith.constant 0 : index
    %c0_6 = arith.constant 0 : index
    %12 = vector.load %arg4[%c0_5, %c0_6] : memref<128x128xf32, #tpu.memory_space<vmem>>, vector<128x128xf32>
    tpu.vector_store %arg4[%c0_5, %c0_6], %11 {strides = array<i32>} : memref<128x128xf32, #tpu.memory_space<vmem>>, vector<128x128xf32>,
    return
  }
  func.func @transform_0(%arg0: i32, %arg1: i32) -> (i32, i32) {
    %c0_i32 = arith.constant 0 : i32
    return %arg0, %arg1 : i32, i32
  }
  func.func @transform_1(%arg0: i32, %arg1: i32) -> (i32, i32) {
    %c0_i32 = arith.constant 0 : i32
    %c0_i32_0 = arith.constant 0 : i32
    %c0_i32_1 = arith.constant 0 : i32
    return %c0_i32, %c0_i32_0 : i32, i32
  }
  func.func @transform_2(%arg0: i32, %arg1: i32) -> (i32, i32) {
    %c0_i32 = arith.constant 0 : i32
    %c0_i32_0 = arith.constant 0 : i32
    return %arg0, %c0_i32 : i32, i32
  }
}

module attributes {stable_mosaic.version = 11 : i64} {
  func.func @_score_kernel(%arg0: i32, %arg1: memref<64x128xf32, #tpu.memory_space<vmem>>, %arg2: memref<64x128xf32, #tpu.memory_space<vmem>>, %arg3: memref<1x128xf32, #tpu.memory_space<vmem>>) attributes {dimension_semantics = [#tpu.dimension_semantics<parallel>], iteration_bounds = array<i64: 1>, scalar_prefetch = 0 : i64, scratch_operands = 0 : i64, tpu.core_type = #tpu.core_type<tc>, window_params = [{transform_indices = @transform_0, window_bounds = array<i64: 64, 128>}, {transform_indices = @transform_1, window_bounds = array<i64: 64, 128>}, {transform_indices = @transform_2, window_bounds = array<i64: 1, 128>}]} {
    %c0 = arith.constant 0 : index
    %c0_0 = arith.constant 0 : index
    %0 = vector.load %arg1[%c0, %c0_0] : memref<64x128xf32, #tpu.memory_space<vmem>>, vector<64x128xf32>
    %c0_1 = arith.constant 0 : index
    %c0_2 = arith.constant 0 : index
    %1 = vector.load %arg2[%c0_1, %c0_2] : memref<64x128xf32, #tpu.memory_space<vmem>>, vector<64x128xf32>
    %2 = arith.mulf %0, %1 : vector<64x128xf32>
    %cst = arith.constant dense<0.000000e+00> : vector<128xf32>
    %3 = vector.multi_reduction <add>, %2, %cst [0] : vector<64x128xf32> to vector<128xf32>
    %4 = vector.shape_cast %3 : vector<128xf32> to vector<1x128xf32>
    %c0_3 = arith.constant 0 : index
    %c0_4 = arith.constant 0 : index
    %5 = vector.load %arg3[%c0_3, %c0_4] : memref<1x128xf32, #tpu.memory_space<vmem>>, vector<1x128xf32>
    tpu.vector_store %arg3[%c0_3, %c0_4], %4 {strides = array<i32>} : memref<1x128xf32, #tpu.memory_space<vmem>>, vector<1x128xf32>,
    return
  }
  func.func @transform_0(%arg0: i32) -> (i32, i32) {
    %c0_i32 = arith.constant 0 : i32
    %c0_i32_0 = arith.constant 0 : i32
    return %c0_i32, %arg0 : i32, i32
  }
  func.func @transform_1(%arg0: i32) -> (i32, i32) {
    %c0_i32 = arith.constant 0 : i32
    %c0_i32_0 = arith.constant 0 : i32
    return %c0_i32, %arg0 : i32, i32
  }
  func.func @transform_2(%arg0: i32) -> (i32, i32) {
    %c0_i32 = arith.constant 0 : i32
    %c0_i32_0 = arith.constant 0 : i32
    return %c0_i32, %arg0 : i32, i32
  }
}

</mosaic_0001>

<bundles_post_ra>
// kernel: lightgcn_forward.7
= control target key start
LH: loop header
LB: loop body
LE: loop exit
PB: predicated region body
PF: predicated region fallthrough
CT: control target
= control target key end

     0   :  { %s487_s1 = inlined_call_operand.vmem [shape: f32[128,128], index: 1, kind: input, shape index: {}]   ;;  %s488_s0 = inlined_call_operand.vmem [shape: bf16[128,128], index: 0, kind: input, shape index: {}]   ;;  %s489_s2 = inlined_call_operand.vmem [shape: f32[128,128], index: 2, kind: output, shape index: {}]  }
   0x1   :  { %v34_v0 = vld [vmem:[%s487_s1] sm:$0xff]  ;;  %v35_v1 = vld [vmem:[%s487_s1 + $0x8] sm:$0xff]  ;;  %v36_v2 = vld [vmem:[%s487_s1 + $0x10] sm:$0xff] }
   0x2   :  { %v50_v3 = vpack.c.bf16 %v35_v1, %v34_v0  ;;  %v37_v4 = vld [vmem:[%s487_s1 + $0x18] sm:$0xff]  ;;  %v38_v6 = vld [vmem:[%s487_s1 + $0x20] sm:$0xff]  ;;  %v39_v7 = vld [vmem:[%s487_s1 + $0x28] sm:$0xff] }
   0x3   :  { %v51_v5 = vpack.c.bf16 %v37_v4, %v36_v2  ;;  %v40_v8 = vld [vmem:[%s487_s1 + $0x30] sm:$0xff]  ;;  %v52_v9 = vpack.c.bf16 %v39_v7, %v38_v6  ;;  %v41_v10 = vld [vmem:[%s487_s1 + $0x38] sm:$0xff]  ;;  %v344_v11 = vld [vmem:[%s488_s0] sm:$0xff]  }
   0x4   :  { %295 = vmatprep.subr.bf16.mxu0 %v50_v3  ;;  %327 = vmatprep.subr.bf16.mxu1 %v50_v3  ;;  %v345_v12 = vld [vmem:[%s488_s0 + $0x20] sm:$0xff]   ;;  %v53_v13 = vpack.c.bf16 %v41_v10, %v40_v8  ;;  %v43_v15 = vld [vmem:[%s487_s1 + $0x48] sm:$0xff]  ;;  %v44_v17 = vld [vmem:[%s487_s1 + $0x50] sm:$0xff] }
   0x5   :  { %296 = vmatpush3.bf16.msra.mxu0 %v50_v3  ;;  %335 = vmatpush3.bf16.msra.mxu1 %v50_v3  ;;  %v42_v14 = vld [vmem:[%s487_s1 + $0x40] sm:$0xff]  ;;  %v45_v18 = vld [vmem:[%s487_s1 + $0x58] sm:$0xff]  ;;  %v47_v21 = vld [vmem:[%s487_s1 + $0x68] sm:$0xff] }
   0x6   :  { %297 = vmatprep.subr.bf16.mxu0 %v51_v5  ;;  %328 = vmatprep.subr.bf16.mxu1 %v51_v5  ;;  %v54_v16 = vpack.c.bf16 %v43_v15, %v42_v14  ;;  %v55_v19 = vpack.c.bf16 %v45_v18, %v44_v17  ;;  %v46_v20 = vld [vmem:[%s487_s1 + $0x60] sm:$0xff]  ;;  %v48_v23 = vld [vmem:[%s487_s1 + $0x70] sm:$0xff]  ;;  %v49_v24 = vld [vmem:[%s487_s1 + $0x78] sm:$0xff] }
   0x7   :  { %311 = vmatprep.mubr.bf16.mxu0 %v344_v11  ;;  %319 = vmatprep.mubr.bf16.mxu1 %v345_v12  ;;  %v56_v22 = vpack.c.bf16 %v47_v21, %v46_v20  ;;  %v57_v25 = vpack.c.bf16 %v49_v24, %v48_v23  ;;  %v346_v26 = vld [vmem:[%s488_s0 + $0x8] sm:$0xff]   ;;  %v348_v28 = vld [vmem:[%s488_s0 + $0x10] sm:$0xff]   ;;  %v350_v30 = vld [vmem:[%s488_s0 + $0x18] sm:$0xff]  }
   0x8   :  { %v347_v27 = vld [vmem:[%s488_s0 + $0x28] sm:$0xff]   ;;  %v349_v29 = vld [vmem:[%s488_s0 + $0x30] sm:$0xff]   ;;  %v351_v31 = vld [vmem:[%s488_s0 + $0x38] sm:$0xff]  }
   0x9   :  { %298 = vmatpush3.bf16.msra.mxu0 %v51_v5  ;;  %336 = vmatpush3.bf16.msra.mxu1 %v51_v5 }
   0xa   :  { %299 = vmatprep.subr.bf16.mxu0 %v52_v9  ;;  %329 = vmatprep.subr.bf16.mxu1 %v52_v9 }
   0xd   :  { %300 = vmatpush3.bf16.msra.mxu0 %v52_v9  ;;  %337 = vmatpush3.bf16.msra.mxu1 %v52_v9 }
   0xe   :  { %301 = vmatprep.subr.bf16.mxu0 %v53_v13  ;;  %330 = vmatprep.subr.bf16.mxu1 %v53_v13 }
  0x11   :  { %302 = vmatpush3.bf16.msra.mxu0 %v53_v13  ;;  %338 = vmatpush3.bf16.msra.mxu1 %v53_v13 }
  0x12   :  { %303 = vmatprep.subr.bf16.mxu0 %v54_v16  ;;  %331 = vmatprep.subr.bf16.mxu1 %v54_v16 }
  0x15   :  { %304 = vmatpush3.bf16.msra.mxu0 %v54_v16  ;;  %339 = vmatpush3.bf16.msra.mxu1 %v54_v16 }
  0x16   :  { %305 = vmatprep.subr.bf16.mxu0 %v55_v19  ;;  %332 = vmatprep.subr.bf16.mxu1 %v55_v19 }
  0x19   :  { %306 = vmatpush3.bf16.msra.mxu0 %v55_v19  ;;  %340 = vmatpush3.bf16.msra.mxu1 %v55_v19 }
  0x1a   :  { %307 = vmatprep.subr.bf16.mxu0 %v56_v22  ;;  %333 = vmatprep.subr.bf16.mxu1 %v56_v22 }
  0x1d   :  { %308 = vmatpush3.bf16.msra.mxu0 %v56_v22  ;;  %341 = vmatpush3.bf16.msra.mxu1 %v56_v22 }
  0x1e   :  { %309 = vmatprep.subr.bf16.mxu0 %v57_v25  ;;  %334 = vmatprep.subr.bf16.mxu1 %v57_v25 }
  0x21   :  { %310 = vmatpush3.bf16.msra.mxu0 %v57_v25  ;;  %342 = vmatpush3.bf16.msra.mxu1 %v57_v25 }
  0x24   :  { %312 = vmatmul.mubr.bf16.vlgmr.msra.gmra.mrb[0].mxu0 %v346_v26  ;;  %320 = vmatmul.mubr.bf16.vlgmr.msra.gmra.mrb[0].mxu1 %v347_v27 }
  0x25   :  { %315 = vmatprep.mubr.bf16.mxu0 %v348_v28  ;;  %323 = vmatprep.mubr.bf16.mxu1 %v349_v29 }
  0x2c   :  { %316 = vmatmul.mubr.bf16.gmra.mrb[4].mxu0 %v350_v30  ;;  %324 = vmatmul.mubr.bf16.gmra.mrb[4].mxu1 %v351_v31 }
  0xf7   :  { %v313_v32 = vpop.f32.mrb[0].mxu0  ;;  %v321_v33 = vpop.f32.mrb[0].mxu1 }
  0xf8   :  { %v172_v34 = vpop.f32.mrb[1].mxu0  ;;  %v204_v35 = vpop.f32.mrb[1].mxu1  ;;  %253 = vst [vmem:[%s489_s2 + $0x10] sm:$0xff] %v313_v32  ;;  %261 = vst [vmem:[%s489_s2 + $0x50] sm:$0xff] %v321_v33 }
  0xf9   :  { %v314_v36 = vpop.f32.mrb[2].mxu0  ;;  %v322_v37 = vpop.f32.mrb[2].mxu1  ;;  %251 = vst [vmem:[%s489_s2] sm:$0xff] %v172_v34  ;;  %259 = vst [vmem:[%s489_s2 + $0x40] sm:$0xff] %v204_v35 }
  0xfa   :  { %v175_v38 = vpop.f32.mrb[3].mxu0  ;;  %v207_v39 = vpop.f32.mrb[3].mxu1  ;;  %254 = vst [vmem:[%s489_s2 + $0x18] sm:$0xff] %v314_v36  ;;  %262 = vst [vmem:[%s489_s2 + $0x58] sm:$0xff] %v322_v37 }
  0xfb   :  { %252 = vst [vmem:[%s489_s2 + $0x8] sm:$0xff] %v175_v38  ;;  %260 = vst [vmem:[%s489_s2 + $0x48] sm:$0xff] %v207_v39 }
  0xff   :  { %v317_v40 = vpop.f32.mrb[4].mxu0  ;;  %v325_v41 = vpop.f32.mrb[4].mxu1 }
 0x100   :  { %v188_v42 = vpop.f32.mrb[5].mxu0  ;;  %v220_v43 = vpop.f32.mrb[5].mxu1  ;;  %257 = vst [vmem:[%s489_s2 + $0x30] sm:$0xff] %v317_v40  ;;  %265 = vst [vmem:[%s489_s2 + $0x70] sm:$0xff] %v325_v41 }
 0x101   :  { %v318_v44 = vpop.f32.mrb[6].mxu0  ;;  %v326_v45 = vpop.f32.mrb[6].mxu1  ;;  %255 = vst [vmem:[%s489_s2 + $0x20] sm:$0xff] %v188_v42  ;;  %263 = vst [vmem:[%s489_s2 + $0x60] sm:$0xff] %v220_v43 }
 0x102   :  { %v191_v46 = vpop.f32.mrb[7].mxu0  ;;  %v223_v47 = vpop.f32.mrb[7].mxu1  ;;  %258 = vst [vmem:[%s489_s2 + $0x38] sm:$0xff] %v318_v44  ;;  %266 = vst [vmem:[%s489_s2 + $0x78] sm:$0xff] %v326_v45 }
 0x103   :  { %256 = vst [vmem:[%s489_s2 + $0x28] sm:$0xff] %v191_v46  ;;  %264 = vst [vmem:[%s489_s2 + $0x68] sm:$0xff] %v223_v47 }

// kernel: lightgcn_forward.13
= control target key start
LH: loop header
LB: loop body
LE: loop exit
PB: predicated region body
PF: predicated region fallthrough
CT: control target
= control target key end

     0   :  { %s119_s0 = inlined_call_operand.vmem [shape: f32[64,128], index: 0, kind: input, shape index: {}]   ;;  %s120_s1 = inlined_call_operand.vmem [shape: f32[64,128], index: 1, kind: input, shape index: {}]   ;;  %s121_s2 = inlined_call_operand.vmem [shape: f32[1,128], index: 2, kind: output, shape index: {}]  }
   0x1   :  { %v11_v0 = vld [vmem:[%s119_s0] sm:$0xff]  ;;  %v12_v1 = vld [vmem:[%s119_s0 + $0x8] sm:$0xff]  ;;  %v13_v2 = vld [vmem:[%s119_s0 + $0x10] sm:$0xff] }
   0x2   :  { %v14_v3 = vld [vmem:[%s119_s0 + $0x18] sm:$0xff]  ;;  %v19_v4 = vld [vmem:[%s120_s1] sm:$0xff]  ;;  %v20_v5 = vld [vmem:[%s120_s1 + $0x8] sm:$0xff] }
   0x3   :  { %v21_v6 = vld [vmem:[%s120_s1 + $0x10] sm:$0xff]  ;;  %v22_v7 = vld [vmem:[%s120_s1 + $0x18] sm:$0xff]  ;;  %v27_v8 = vmul.f32 %v19_v4, %v11_v0  ;;  %v28_v9 = vmul.f32 %v20_v5, %v12_v1  ;;  %v15_v11 = vld [vmem:[%s119_s0 + $0x20] sm:$0xff] }
   0x4   :  { %v29_v10 = vmul.f32 %v21_v6, %v13_v2  ;;  %v23_v12 = vld [vmem:[%s120_s1 + $0x20] sm:$0xff]  ;;  %v30_v13 = vmul.f32 %v22_v7, %v14_v3  ;;  %v16_v15 = vld [vmem:[%s119_s0 + $0x28] sm:$0xff]  ;;  %v17_v19 = vld [vmem:[%s119_s0 + $0x30] sm:$0xff] }
   0x5   :  { %v35_v14 = vadd.f32 %v28_v9, %v27_v8  ;;  %v24_v16 = vld [vmem:[%s120_s1 + $0x28] sm:$0xff]  ;;  %v31_v17 = vmul.f32 %v23_v12, %v15_v11  ;;  %v25_v20 = vld [vmem:[%s120_s1 + $0x30] sm:$0xff]  ;;  %v18_v23 = vld [vmem:[%s119_s0 + $0x38] sm:$0xff] }
   0x6   :  { %v32_v21 = vmul.f32 %v24_v16, %v16_v15  ;;  %v26_v24 = vld [vmem:[%s120_s1 + $0x38] sm:$0xff]  ;;  %v33_v25 = vmul.f32 %v25_v20, %v17_v19 }
   0x7   :  { %v36_v18 = vadd.f32 %v35_v14, %v29_v10  ;;  %v34_v27 = vmul.f32 %v26_v24, %v18_v23 }
   0x9   :  { %v37_v22 = vadd.f32 %v36_v18, %v30_v13 }
   0xb   :  { %v38_v26 = vadd.f32 %v37_v22, %v31_v17 }
   0xd   :  { %v39_v28 = vadd.f32 %v38_v26, %v32_v21 }
   0xf   :  { %v40_v29 = vadd.f32 %v39_v28, %v33_v25 }
  0x11   :  { %v41_v30 = vadd.f32 %v40_v29, %v34_v27 }
  0x13   :  { %v42_v31 = vrot.slane %v41_v30, 4 }
  0x15   :  { %v43_v32 = vadd.f32 %v42_v31, %v41_v30 }
  0x17   :  { %v44_v33 = vrot.slane %v43_v32, 2 }
  0x19   :  { %v45_v34 = vadd.f32 %v44_v33, %v43_v32 }
  0x1b   :  { %v46_v35 = vrot.slane %v45_v34, 1 }
  0x1d   :  { %v47_v36 = vadd.f32 %v46_v35, %v45_v34 }
  0x1f   :  { %48 = vst [vmem:[%s121_s2] sm:$0x1] %v47_v36 }

</bundles_post_ra>
